<compile_context>
chip_gen: v7x
topology: tpu7x:2x2x1
jax: 0.10.0
libtpu: 0.0.40
codegen_flags: <defaults>
</compile_context>

<pallas_src>
import jax
import jax.numpy as jnp
from jax.experimental import pallas as pl
from jax.experimental.pallas import tpu as pltpu

LEAD = 8  # one leading sublane tile on the token axis: rows 0..6 dead, row 7 = cls token


def embeddings3d_kernel(patch_ref, w_ref, pos_ref, out_ref):
    # patch_ref: (Bt, tn, Pp) bf16     w_ref: (Pp, Hp) bf16
    # pos_ref:   (tn, Hp) f32  (conv bias folded in; cls row already contains cls+pos0)
    # out_ref:   (Bt, tn, Hp)
    bt, tn, p = patch_ref.shape
    hp = w_ref.shape[1]
    # Fold batch into the MXU M dimension (layout-free merge: tn % 8 == 0 by construction).
    lhs = patch_ref[...].reshape(bt * tn, p)
    emb = jnp.dot(lhs, w_ref[...], preferred_element_type=jnp.float32)   # (bt*tn, Hp) f32
    emb = emb.reshape(bt, tn, hp) + pos_ref[...]                         # bcast over Bt, f32
    out_ref[...] = emb.astype(out_ref.dtype)


def _round_up(x, m):
    return (x + m - 1) // m * m


def _vmem_capacity_bytes():
    try:
        cap = getattr(pltpu.get_tpu_info(), "vmem_capacity_bytes", None)
        if cap:
            return int(cap)
    except Exception:
        pass
    return 64 << 20   # conservative default: v7x per-TensorCore VMEM


def embeddings3d(x, conv_w, conv_b, cls_token, pos_emb, patch_size, *,
                 compute_dtype=jnp.bfloat16, out_dtype=None):
    """x: (B, C, T, H, W).  conv_w: (hidden, C, pT, pH, pW).  conv_b: (hidden,).
    cls_token: (1, 1, hidden).  pos_emb: (1, N+1, hidden).  Returns (B, N+1, hidden)."""
    B, C, T, H, W = x.shape
    pT, pH, pW = patch_size
    hidden = conv_w.shape[0]
    nT, nH, nW = T // pT, H // pH, W // pW
    N = nT * nH * nW
    P = C * pT * pH * pW
    Hp = _round_up(hidden, 128)     # lane-dense hidden: unmasked stores, full MXU output cols
    Pp = _round_up(P, 128)          # lane-dense K: unmasked patch loads, aligned MXU K
    out_dtype = jnp.dtype(x.dtype if out_dtype is None else out_dtype)

    # --- im2col patch extraction (Conv3d with stride == kernel), in bf16 to halve the
    #     HBM relayout traffic.  Column order (c, kt, kh, kw) matches the Conv3d weight
    #     flattening; row order (t, h, w) matches x.flatten(2) in PyTorch.
    # TODO(synk): fuse this gather into the kernel (memory_space=pl.ANY + per-tile
    #             pltpu.make_async_copy double-buffering) to drop one full HBM pass.
    patches = x.astype(compute_dtype).reshape(B, C, nT, pT, nH, pH, nW, pW)
    patches = patches.transpose(0, 2, 4, 6, 1, 3, 5, 7).reshape(B, N, P)

    # --- tiling.  Token axis gets LEAD(=8) leading rows (cls in row 7) and is padded up to a
    #     multiple of tn so every block is full and sublane-aligned.
    Np0 = LEAD + N
    k = pl.cdiv(Np0, 512)                        # aim for ~512 MXU rows per step (2x256x256)
    tn = _round_up(pl.cdiv(Np0, k), 8)
    Np = _round_up(Np0, tn)
    Bt = max(1, min(B, 512 // max(tn, 1)))       # fold batch into M until ~512 rows

    if (Np // tn) * pl.cdiv(B, Bt) < 2:          # keep >= 2 grid steps: v7x 2 TCs / megacore
        if B > 1:
            Bt = max(1, Bt // 2)
        elif tn > 8:
            tn = max(8, _round_up(pl.cdiv(tn, 2), 8))
            Np = _round_up(Np0, tn)

    # --- VMEM guard: shrink Bt then tn until the double-buffered estimate fits ~3/4 of
    #     physical VMEM (48 MiB on v7x, 96 MiB on v5e/v6e).
    cdt = jnp.dtype(compute_dtype).itemsize
    odt = out_dtype.itemsize

    def vmem_est(bt, t):
        # TODO(synk): single-buffer the constant weight (pipeline_mode=pl.Buffered(1)) and/or
        #             add an Hp grid axis for extreme hidden sizes; counted at 2 buffers here.
        return (2 * bt * t * Pp * cdt          # patches
                + 2 * Pp * Hp * cdt            # projection weight
                + 2 * t * Hp * 4               # pos(+bias+cls), f32
                + 2 * bt * t * Hp * odt)       # output

    vmem_cap = _vmem_capacity_bytes()
    budget = (vmem_cap * 3) // 4
    while vmem_est(Bt, tn) > budget and (Bt > 1 or tn > 8):
        if Bt > 1:
            Bt = max(1, Bt // 2)
        else:
            tn = max(8, _round_up(tn // 2, 8))
            Np = _round_up(Np0, tn)

    # --- operands (all padding folded into the same wrapper-side relayout/copies).
    # Patches: rows 0..LEAD-1 are zero (so row 7's embedding comes purely from pos_full).
    patches_p = jnp.pad(patches, ((0, 0), (LEAD, Np - Np0), (0, Pp - P)))
    # Projection weight (Pp, Hp), bf16 MXU operand; zero K-pad rows match patch K-pad cols.
    w_mat = conv_w.reshape(hidden, P).T.astype(compute_dtype)
    w_mat = jnp.pad(w_mat, ((0, Pp - P), (0, Hp - hidden)))
    # Batch-invariant additive term, f32: row 7 = cls_token + pos_emb[:,0];
    # rows 8..8+N-1 = pos_emb[:,1:] + conv bias; all other rows are dead zeros.
    cls_row = (cls_token.reshape(1, hidden) + pos_emb[0, 0:1, :]).astype(jnp.float32)
    pos_patch = (pos_emb[0, 1:, :] + conv_b[None, :]).astype(jnp.float32)
    pos_full = jnp.concatenate(
        [jnp.zeros((LEAD - 1, hidden), jnp.float32), cls_row, pos_patch,
         jnp.zeros((Np - Np0, hidden), jnp.float32)], axis=0)
    pos_full = jnp.pad(pos_full, ((0, 0), (0, Hp - hidden)))

    grid = (Np // tn, pl.cdiv(B, Bt))   # token tiles outer, batch inner: pos/weight DMA'd once
    compiler_params = pltpu.CompilerParams(
        dimension_semantics=("parallel", "parallel"),
        vmem_limit_bytes=int(min(vmem_cap * 7 // 8,
                                 max(2 * vmem_est(Bt, tn), 32 << 20))),
    )
    cost = pl.CostEstimate(
        flops=2 * B * Np * Pp * Hp,
        transcendentals=0,
        bytes_accessed=int(B * Np * Pp * cdt + Pp * Hp * cdt + Np * Hp * 4
                           + B * Np * Hp * odt),
    )

    out = pl.pallas_call(
        embeddings3d_kernel,
        out_shape=jax.ShapeDtypeStruct((B, Np, Hp), out_dtype),
        grid_spec=pltpu.PrefetchScalarGridSpec(
            num_scalar_prefetch=0,
            grid=grid,
            in_specs=[
                pl.BlockSpec((Bt, tn, Pp), lambda n, b: (b, n, 0)),   # patches
                pl.BlockSpec((Pp, Hp), lambda n, b: (0, 0)),          # projection weight
                pl.BlockSpec((tn, Hp), lambda n, b: (n, 0)),          # pos(+bias, cls row)
            ],
            out_specs=pl.BlockSpec((Bt, tn, Hp), lambda n, b: (b, n, 0)),
        ),
        compiler_params=compiler_params,
        cost_estimate=cost,
    )(patches_p, w_mat, pos_full)

    # Single slice drops the 7 dead lead rows, the token pad and the lane pad in one go
    # (replaces the previous separate lane-slice + concat pair).
    # TODO(synk): training-mode dropout would need pltpu.prng_* inside the kernel.
    return out[:, LEAD - 1:LEAD + N, :hidden]


def embeddings3d_ref(x, conv_w, conv_b, cls_token, pos_emb, patch_size,
                     compute_dtype=jnp.bfloat16):
    """Pure-JAX reference (im2col matmul, mirroring the kernel's bf16 MXU operands)."""
    B, C, T, H, W = x.shape
    pT, pH, pW = patch_size
    hidden = conv_w.shape[0]
    nT, nH, nW = T // pT, H // pH, W // pW
    pmat = x.reshape(B, C, nT, pT, nH, pH, nW, pW).transpose(0, 2, 4, 6, 1, 3, 5, 7)
    pmat = pmat.reshape(B, nT * nH * nW, C * pT * pH * pW).astype(compute_dtype)
    w_mat = conv_w.reshape(hidden, -1).T.astype(compute_dtype)
    emb = jnp.einsum("bnp,ph->bnh", pmat, w_mat, preferred_element_type=jnp.float32)
    emb = emb + conv_b[None, None, :]
    cls = jnp.broadcast_to(cls_token, (B, 1, hidden)).astype(jnp.float32)
    tokens = jnp.concatenate([cls, emb], axis=1)
    return (tokens + pos_emb).astype(x.dtype)


if __name__ == "__main__":
    # Small shapes consistent with the module:
    #   img_size=16, num_frame=8, in_channels=4, patch_size=(4,4,4), hidden=32
    #   => n_patches = (8/4)*(16/4)*(16/4) = 32
    B, C, T, H, W = 2, 4, 8, 16, 16
    patch_size = (4, 4, 4)
    hidden = 32
    N = (T // patch_size[0]) * (H // patch_size[1]) * (W // patch_size[2])

    key = jax.random.PRNGKey(0)
    kx, kw, kb, kc, kp = jax.random.split(key, 5)
    x = jax.random.normal(kx, (B, C, T, H, W), dtype=jnp.float32)
    conv_w = 0.02 * jax.random.normal(kw, (hidden, C, *patch_size), dtype=jnp.float32)
    conv_b = 0.01 * jax.random.normal(kb, (hidden,), dtype=jnp.float32)
    cls_token = 0.02 * jax.random.normal(kc, (1, 1, hidden), dtype=jnp.float32)
    pos_emb = 0.02 * jax.random.normal(kp, (1, N + 1, hidden), dtype=jnp.float32)

    out = embeddings3d(x, conv_w, conv_b, cls_token, pos_emb, patch_size)
    out = jax.block_until_ready(out)

    ref = embeddings3d_ref(x, conv_w, conv_b, cls_token, pos_emb, patch_size)
    assert out.shape == (B, N + 1, hidden), out.shape
    err = float(jnp.max(jnp.abs(out - ref)))
    assert jnp.allclose(out, ref, atol=2e-3, rtol=2e-3), err
    print("KERNEL_OK")
</pallas_src>

<mosaic_0001>
module attributes {stable_mosaic.version = 11 : i64} {
  func.func @embeddings3d_kernel(%arg0: i32, %arg1: i32, %arg2: memref<1x40x256xbf16, #tpu.memory_space<vmem>>, %arg3: memref<256x128xbf16, #tpu.memory_space<vmem>>, %arg4: memref<40x128xf32, #tpu.memory_space<vmem>>, %arg5: memref<1x40x128xf32, #tpu.memory_space<vmem>>) attributes {dimension_semantics = [#tpu.dimension_semantics<parallel>, #tpu.dimension_semantics<parallel>], iteration_bounds = array<i64: 1, 2>, scalar_prefetch = 0 : i64, scratch_operands = 0 : i64, tpu.core_type = #tpu.core_type<tc>, window_params = [{transform_indices = @transform_0, window_bounds = array<i64: 1, 40, 256>}, {pipeline_mode = #tpu.pipeline_mode<synchronous>, transform_indices = @transform_1, window_bounds = array<i64: 256, 128>}, {transform_indices = @transform_2, window_bounds = array<i64: 40, 128>}, {transform_indices = @transform_3, window_bounds = array<i64: 1, 40, 128>}]} {
    %c0 = arith.constant 0 : index
    %c0_0 = arith.constant 0 : index
    %c0_1 = arith.constant 0 : index
    %0 = vector.load %arg2[%c0, %c0_0, %c0_1] : memref<1x40x256xbf16, #tpu.memory_space<vmem>>, vector<1x40x256xbf16>
    %1 = vector.shape_cast %0 : vector<1x40x256xbf16> to vector<40x256xbf16>
    %c0_2 = arith.constant 0 : index
    %c0_3 = arith.constant 0 : index
    %2 = vector.load %arg3[%c0_2, %c0_3] : memref<256x128xbf16, #tpu.memory_space<vmem>>, vector<256x128xbf16>
    %cst = arith.constant dense<0.000000e+00> : vector<40x128xf32>
    %3 = tpu.matmul %1, %2, %cst {dimension_numbers = #tpu.dot_dimension_numbers<[1], [0], [0], [1], [0, 0, 1, 1], [], []>} : vector<40x256xbf16>, vector<256x128xbf16>, vector<40x128xf32> -> vector<40x128xf32>
    %4 = vector.shape_cast %3 : vector<40x128xf32> to vector<1x40x128xf32>
    %c0_4 = arith.constant 0 : index
    %c0_5 = arith.constant 0 : index
    %5 = vector.load %arg4[%c0_4, %c0_5] : memref<40x128xf32, #tpu.memory_space<vmem>>, vector<40x128xf32>
    %6 = vector.shape_cast %5 : vector<40x128xf32> to vector<1x40x128xf32>
    %7 = arith.addf %4, %6 : vector<1x40x128xf32>
    %c0_6 = arith.constant 0 : index
    %c0_7 = arith.constant 0 : index
    %c0_8 = arith.constant 0 : index
    %8 = vector.load %arg5[%c0_6, %c0_7, %c0_8] : memref<1x40x128xf32, #tpu.memory_space<vmem>>, vector<1x40x128xf32>
    tpu.vector_store %arg5[%c0_6, %c0_7, %c0_8], %7 {strides = array<i32>} : memref<1x40x128xf32, #tpu.memory_space<vmem>>, vector<1x40x128xf32>,
    return
  }
  func.func @transform_0(%arg0: i32, %arg1: i32) -> (i32, i32, i32) {
    %c0_i32 = arith.constant 0 : i32
    %c0_i32_0 = arith.constant 0 : i32
    return %arg1, %arg0, %c0_i32 : i32, i32, i32
  }
  func.func @transform_1(%arg0: i32, %arg1: i32) -> (i32, i32) {
    %c0_i32 = arith.constant 0 : i32
    %c0_i32_0 = arith.constant 0 : i32
    %c0_i32_1 = arith.constant 0 : i32
    return %c0_i32, %c0_i32_0 : i32, i32
  }
  func.func @transform_2(%arg0: i32, %arg1: i32) -> (i32, i32) {
    %c0_i32 = arith.constant 0 : i32
    %c0_i32_0 = arith.constant 0 : i32
    return %arg0, %c0_i32 : i32, i32
  }
  func.func @transform_3(%arg0: i32, %arg1: i32) -> (i32, i32, i32) {
    %c0_i32 = arith.constant 0 : i32
    %c0_i32_0 = arith.constant 0 : i32
    return %arg1, %arg0, %c0_i32 : i32, i32, i32
  }
}

</mosaic_0001>

<bundles_post_ra>
// kernel: tpu_custom_call.1
= control target key start
LH: loop header
LB: loop body
LE: loop exit
PB: predicated region body
PF: predicated region fallthrough
CT: control target
= control target key end

     0   :  { %8 = vsyncpa [#allocation3], 0  ;;  %s1280_s0 = inlined_call_operand.hbm [shape: bf16[2,40,256], index: 0, kind: input, shape index: {}]   ;;  %s1281_s1 = inlined_call_operand.hbm [shape: bf16[256,128], index: 1, kind: input, shape index: {}]   ;;  %s1282_s2 = inlined_call_operand.hbm [shape: f32[40,128], index: 2, kind: input, shape index: {}]   ;;  %s1283_s3 = inlined_call_operand.hbm [shape: f32[2,40,128], index: 3, kind: output, shape index: {}]  }
   0x1   :  { %10 = vsyncpa [#allocation3 + $0x1], 0 }
   0x2   :  { %11 = vsyncpa [#allocation6], 0 }
   0x3   :  { %12 = vsyncpa [#allocation4], 0 }
   0x4   :  { %14 = vsyncpa [#allocation4 + $0x1], 0  ;;  %s1010_s12 = smov 0   ;;  %s1012_s13 = smov 0  }
   0x5   :  { %s1014_s14 = smov 0   ;;  %s1016_s15 = smov 0  }
   0x6   :  { %s1018_s16 = smov 0   ;;  %s1020_s17 = smov 0  }
   0x7 LB: > { %s604_s18 = sadd.s32 4294967295, %s978_s17   ;;  %s605_s19 = sadd.s32 4294967294, %s978_s17   ;;  %s978_s17 = sphi %s1020_s17, %s20_s17   ;;  %s974_s16 = sphi %s1018_s16, %s1305_s16   ;;  %s970_s15 = sphi %s1016_s15, %s1304_s15   ;;  %s966_s14 = sphi %s1014_s14, %s1303_s14   ;;  %s962_s13 = sphi %s1012_s13, %s1302_s13   ;;  %s958_s12 = sphi %s1010_s12, %s1301_s12  }
   0x8   : > { %p54_p0 = scmp.ne.s32.totalorder %s962_s13, %s958_s12  ;;  %p1044_p1 = scmp.eq.s32.totalorder %s604_s18, 0 }
   0x9   : > { %p1048_p2 = scmp.eq.s32.totalorder %s604_s18, 1  ;;  %p133_p3 = scmp.eq.s32.totalorder %s605_s19, 1 }
   0xa   : > { %s1288_s20 = scalar_select %p1044_p1, 1, 0 }
   0xb   : > { %p1054_p4 = por %p1044_p1, %p54_p0  ;;  %p606_p5 = scmp.ge.s32.totalorder %s978_s17, 1 }
   0xc   : > { %p1059_p6 = por %p133_p3, %p54_p0  ;;  %p140_p7 = scmp.lt.s32.totalorder %s978_s17, 3 }
   0xd   : > { %s1290_s22 = scalar_select %p1054_p4, 1, 0 }
   0xe   : > { %s1291_s23 = scalar_select %p1059_p6, 1, 0 }
   0xf   : > { %p1064_p8 = pnand %p606_p5, %p140_p7  ;;  %s980_s25 = smov [#allocation5]  }
  0x10   : > { %s152_s26 = sshll.u32 %s980_s25, 4  ;;  %s981_s28 = smov [#allocation7]   ;;  %s1068_s26 = int_to_ptr.vmem [resolvable:$true] %s152_s26 }
  0x11   : > { %p705_p9 = pneg %p1064_p8  ;;  %s168_s29 = sshll.u32 %s981_s28, 4  ;;  %s1079_s29 = int_to_ptr.vmem [resolvable:$true] %s168_s29 }
  0x12   : > { %s806_s5 = scalar_lea.hbm %s1281_s1, 2048 }
  0x13   : > { %p1075_p11 = pnand %p705_p9, %p1044_p1  ;;  %p807_p12 = scmp.ne.s32.totalorder %s1281_s1, %s806_s5 }
  0x14   : > { %p813_p5 = scmp.lt.u32.totalorder %s806_s5, %s1281_s1 }
  0x15   : > { %p808_p13 = pneg %p1075_p11 }
  0x17   : > { %p809_p0 = pnand %p808_p13, %p807_p12 }
  0x19   : > { %p810_p3 = pneg %p809_p0 }
  0x1b   : > { %p815_p7 = pnand %p813_p5, %p810_p3 }
  0x1d   : > { %818 = shalt.err (!%p815_p7)
}
  0x1e   : > { %s819_s10 = scalar_lea.vmem %s1068_s26, 2048  ;;  %p827_p1 = scmp.lt.s32.totalorder %s1068_s26, %s1068_s26 }
  0x1f   : > { %p820_p9 = scmp.ne.s32.totalorder %s1068_s26, %s819_s10  ;;  %p828_p12 = scmp.lt.s32.totalorder %s819_s10, %s819_s10 }
  0x21   : > { %p822_p10 = pnand %p820_p9, %p808_p13  ;;  %p829_p0 = por %p828_p12, %p827_p1 }
  0x23   : > { %p823_p6 = pneg %p822_p10 }
  0x25   : > { %p830_p4 = pnand %p829_p0, %p823_p6 }
  0x27   : > { %833 = shalt.err (!%p830_p4)
}
  0x28   : > { %s982_s11 = smov 64   ;;  %s983_s18 = smov 4  }
  0x29   : > { %708 = dma.hbm_to_vmem [thread:$0]  (!%p1075_p11), %s1281_s1, 2048, %s1068_s26, [#allocation6], %s982_s11, %s982_s11, %s983_s18  }
  0x2a   : > { %s834_s4 = scalar_lea.hbm %s1282_s2, 640 }
  0x2b   : > { %p835_p1 = scmp.ne.s32.totalorder %s1282_s2, %s834_s4  ;;  %p841_p10 = scmp.lt.u32.totalorder %s834_s4, %s1282_s2 }
  0x2d   : > { %p837_p4 = pnand %p835_p1, %p808_p13 }
  0x2f   : > { %p838_p6 = pneg %p837_p4 }
  0x31   : > { %p843_p3 = pnand %p841_p10, %p838_p6 }
  0x33   : > { %846 = shalt.err (!%p843_p3)
}
  0x34   : > { %s847_s26 = scalar_lea.vmem %s1079_s29, 640  ;;  %p855_p12 = scmp.lt.s32.totalorder %s1079_s29, %s1079_s29 }
  0x35   : > { %p848_p5 = scmp.ne.s32.totalorder %s1079_s29, %s847_s26  ;;  %p856_p0 = scmp.lt.s32.totalorder %s847_s26, %s847_s26 }
  0x37   : > { %p850_p7 = pnand %p848_p5, %p808_p13  ;;  %p857_p1 = por %p856_p0, %p855_p12 }
  0x39   : > { %p851_p9 = pneg %p850_p7 }
  0x3b   : > { %p858_p4 = pnand %p857_p1, %p851_p9 }
  0x3d   : > { %861 = shalt.err (!%p858_p4)
}
  0x3e   : > { %s984_s9 = smov 128   ;;  %s985_s10 = smov 8  }
  0x3f   : > { %711 = dma.hbm_to_vmem [thread:$0]  (!%p1075_p11), %s1282_s2, 640, %s1079_s29, [#allocation6], %s984_s9, %s984_s9, %s985_s10  }
  0x40   : > { %s29_s19 = sadd.s32 1, %s974_s16  ;;  %s41_s25 = sadd.s32 1, %s966_s14 }
  0x41   : > { %p30_p13 = scmp.ge.s32.totalorder %s29_s19, 2  ;;  %p48_p6 = scmp.ne.s32.totalorder %s966_s14, %s962_s13 }
  0x42   : > { %p49_p10 = scmp.eq.s32.totalorder %s978_s17, 0  ;;  %p722_p3 = scmp.lt.s32.totalorder %s978_s17, 2 }
  0x43   : > { %s1307_s19 = smov (%p30_p13, %s29_s19), 0  ;;  %p1146_p7 = por %p1048_p2, %p48_p6 }
  0x44   : > { %p50_p5 = por %p49_p10, %p48_p6  ;;  %s36_s28 = ssub.s32 %s974_s16, %s1307_s19 }
  0x45   : > { %s1294_s27 = scalar_select %p1146_p7, 1, 0 }
  0x46   : > { %s182_s30 = sand.u32 1, %s966_s14   ;;  %p39_p9 = scmp.eq.s32.totalorder %s36_s28, 0 }
  0x47   : > { %s689_s29 = smul.u32 40, %s182_s30  ;;  %p1153_p11 = pnand %p722_p3, %p50_p5 }
  0x48   : > { %s1158_s5 = scalar_select %p39_p9, %s966_s14, %s41_s25  }
  0x49   : > { %s690_s6 = smul.u32 640, %s974_s16  ;;  %s186_s7 = scalar_lea.vmem [#allocation2], %s689_s29 }
  0x4a   : > { %s196_s8 = sshll.u32 %s186_s7, 4  ;;  %s1168_s18 = scalar_lea.sflag [#allocation3], %s182_s30  ;;  %s1166_s8 = int_to_ptr.vmem [resolvable:$true] %s196_s8 }
  0x4b   : > { %s1164_s11 = scalar_lea.hbm %s1280_s0, %s690_s6  ;;  %p864_p12 = pneg %p1153_p11 }
  0x4c   : > { %s862_s28 = scalar_lea.hbm %s1164_s11, 640  ;;  %s867_s6 = scalar_lea.hbm %s1280_s0, 1280 }
  0x4d   : > { %p863_p2 = scmp.ne.s32.totalorder %s1164_s11, %s862_s28  ;;  %p868_p4 = scmp.lt.u32.totalorder %s1164_s11, %s1280_s0 }
  0x4e   : > { %p869_p13 = scmp.lt.u32.totalorder %s867_s6, %s862_s28  ;;  %p871_p10 = scmp.lt.u32.totalorder %s862_s28, %s1164_s11 }
  0x4f   : > { %p865_p0 = pnand %p864_p12, %p863_p2 }
  0x50   : > { %p870_p6 = por %p869_p13, %p868_p4 }
  0x51   : > { %p866_p1 = pneg %p865_p0 }
  0x52   : > { %p872_p3 = por %p871_p10, %p870_p6 }
  0x54   : > { %p873_p5 = pnand %p872_p3, %p866_p1 }
  0x56   : > { %876 = shalt.err (!%p873_p5)
}
  0x57   : > { %s877_s30 = scalar_lea.vmem %s1166_s8, 640  ;;  %s986_s26 = smov [#allocation2]  }
  0x58   : > { %p878_p9 = scmp.ne.s32.totalorder %s1166_s8, %s877_s30  ;;  %s882_s25 = sshll.u32 %s986_s26, 4  ;;  %s883_s25 = int_to_ptr.vmem [resolvable:$false] %s882_s25 }
  0x59   : > { %s884_s29 = scalar_lea.vmem %s883_s25, 1280  ;;  %p885_p7 = scmp.lt.s32.totalorder %s1166_s8, %s883_s25 }
  0x5a   : > { %p880_p2 = pnand %p878_p9, %p864_p12  ;;  %p886_p4 = scmp.lt.s32.totalorder %s884_s29, %s877_s30 }
  0x5c   : > { %p881_p0 = pneg %p880_p2  ;;  %p887_p13 = por %p886_p4, %p885_p7 }
  0x5e   : > { %p888_p6 = pnand %p887_p13, %p881_p0 }
  0x60   : > { %891 = shalt.err (!%p888_p6)
}
  0x61   : > { %715 = dma.hbm_to_vmem [thread:$0]  (!%p1153_p11), %s1164_s11, 640, %s1166_s8, %s1168_s18, %s984_s9, %s984_s9, %s985_s10  }
  0x62   : > { %208 = sbr.rel (%p1064_p8) target bundleno = 382 (0x17e), region = 32  ;;  %s1202_s28 = sand.u32 (!%p1064_p8), 1, %s962_s13  }
  0x63   : > { %s691_s6 = smul.u32 (!%p1064_p8), 40, %s1202_s28  ;;  %s211_s7 = scalar_lea.sflag (!%p1064_p8), [#allocation3], %s1202_s28 }
  0x64   : > { %p1296_p7 = scmp.ne.s32.totalorder (!%p1064_p8), %s1290_s22, 0 }
  0x65   : > { %s1208_s4 = scalar_lea.vmem (!%p1064_p8), [#allocation2], %s691_s6 }
  0x69   : > { %945 = dma.done.wait (%p1296_p7), %s211_s7, 640  }
  0x6a   : > { %947 = vsyncadd (%p1296_p7), %s211_s7, 4294966656  ;;  %p1297_p11 = scmp.ne.s32.totalorder %s1288_s20, 0 }
  0x6c   : > { %949 = dma.done.wait (%p1297_p11), [#allocation6], 2688  }
  0x6d   : > { %951 = vsyncadd (%p1297_p11), [#allocation6], 4294964608  ;;  %v782_v0 = vld [vmem:[#allocation5 + $0x40] sm:$0xff]   ;;  %v784_v2 = vld [vmem:[#allocation5 + $0x48] sm:$0xff]   ;;  %s244_s20 = scalar_lea.vmem [#allocation8], %s691_s6  ;;  %s692_s24 = smul.u32 640, %s970_s15 }
  0x6e   : > { %v783_v1 = vld [vmem:[#allocation5] sm:$0xff]   ;;  %673 = vmatprep.subr.bf16.mxu1 %v782_v0  ;;  %639 = vmatprep.subr.bf16.mxu0 %v782_v0  ;;  %v785_v3 = vld [vmem:[#allocation5 + $0x8] sm:$0xff]   ;;  %v786_v4 = vld [vmem:[#allocation5 + $0x50] sm:$0xff]   ;;  %s496_s22 = sshll.u32 %s244_s20, 4  ;;  %s481_s15 = scalar_lea.sflag [#allocation4], %s1202_s28  ;;  %s1226_s22 = int_to_ptr.vmem [resolvable:$true] %s496_s22 }
  0x6f   : > { %681 = vmatpush3.bf16.msra.mxu1 %v783_v1  ;;  %640 = vmatpush3.bf16.msra.mxu0 %v783_v1  ;;  %v787_v5 = vld [vmem:[#allocation5 + $0x10] sm:$0xff]   ;;  %v788_v6 = vld [vmem:[#allocation5 + $0x58] sm:$0xff]   ;;  %v790_v8 = vld [vmem:[#allocation5 + $0x60] sm:$0xff]   ;;  %s1231_s8 = scalar_lea.hbm %s1283_s3, %s692_s24  ;;  %s892_s11 = scalar_lea.vmem %s1226_s22, 640 }
  0x70   : > { %674 = vmatprep.subr.bf16.mxu1 %v784_v2  ;;  %641 = vmatprep.subr.bf16.mxu0 %v784_v2  ;;  %v789_v7 = vld [vmem:[#allocation5 + $0x18] sm:$0xff]   ;;  %v791_v9 = vld [vmem:[#allocation5 + $0x20] sm:$0xff]   ;;  %v792_v10 = vld [vmem:[#allocation5 + $0x68] sm:$0xff]   ;;  %p893_p8 = scmp.ne.s32.totalorder %s1226_s22, %s892_s11  ;;  %p1298_p12 = scmp.ne.s32.totalorder %s1294_s27, 0 }
  0x71   : > { %v800_v11 = vld [vmem:[%s1208_s4 + $0x14] ss:$8 sps:$4 sm:$0xff]   ;;  %v803_v12 = vld [vmem:[%s1208_s4 + $0x4] ss:$8 sps:$4 sm:$0xff]   ;;  %v798_v19 = vld [vmem:[%s1208_s4 + $0x10] ss:$8 sps:$4 sm:$0xff]  }
  0x72   : > { %v793_v13 = vld [vmem:[#allocation5 + $0x28] sm:$0xff]   ;;  %v794_v14 = vld [vmem:[#allocation5 + $0x70] sm:$0xff]   ;;  %449 = vmatprep.mubr.bf16.mxu1 %v800_v11  ;;  %441 = vmatprep.mubr.bf16.mxu0 %v803_v12  ;;  %v796_v16 = vld [vmem:[#allocation5 + $0x78] sm:$0xff]   ;;  %p894_p1 = pnand %p893_p8, %p1298_p12  ;;  %s987_s18 = smov [#allocation8]  }
  0x73   : > { %682 = vmatpush3.bf16.msra.mxu1 %v785_v3  ;;  %642 = vmatpush3.bf16.msra.mxu0 %v785_v3  ;;  %v795_v15 = vld [vmem:[#allocation5 + $0x30] sm:$0xff]   ;;  %v797_v17 = vld [vmem:[#allocation5 + $0x38] sm:$0xff]   ;;  %v465_v28 = vld [vmem:[#allocation7] sm:$0xff]  ;;  %s896_s21 = sshll.u32 %s987_s18, 4  ;;  %s897_s21 = int_to_ptr.vmem [resolvable:$false] %s896_s21 }
  0x74   : > { %675 = vmatprep.subr.bf16.mxu1 %v786_v4  ;;  %643 = vmatprep.subr.bf16.mxu0 %v786_v4  ;;  %v253_v18 = vld [vmem:[%s1208_s4 + $0x20] sm:$0xff]  ;;  %v466_v36 = vld [vmem:[#allocation7 + $0x8] sm:$0xff]  ;;  %v469_v45 = vld [vmem:[#allocation7 + $0x20] sm:$0xff]  ;;  %p895_p10 = pneg %p894_p1  ;;  %s898_s30 = scalar_lea.vmem %s897_s21, 1280 }
  0x75   : > { %v801_v20 = vld [vmem:[%s1208_s4] ss:$8 sps:$4 sm:$0xff]   ;;  %v619_v21 = vcombine.high %v253_v18, %v253_v18  ;;  %v618_v22 = vcombine.low %v253_v18, %v253_v18  ;;  %p899_p3 = scmp.lt.s32.totalorder %s1226_s22, %s897_s21  ;;  %p900_p5 = scmp.lt.s32.totalorder %s898_s30, %s892_s11 }
  0x76   : > { %v467_v26 = vld [vmem:[#allocation7 + $0x10] sm:$0xff]  ;;  %v468_v34 = vld [vmem:[#allocation7 + $0x18] sm:$0xff] }
  0x77   : > { %683 = vmatpush3.bf16.msra.mxu1 %v787_v5  ;;  %644 = vmatpush3.bf16.msra.mxu0 %v787_v5  ;;  %p901_p9 = por %p900_p5, %p899_p3 }
  0x78   : > { %676 = vmatprep.subr.bf16.mxu1 %v788_v6  ;;  %645 = vmatprep.subr.bf16.mxu0 %v788_v6 }
  0x79   : > { %p902_p2 = pnand %p901_p9, %p895_p10 }
  0x7b   : > { %684 = vmatpush3.bf16.msra.mxu1 %v789_v7  ;;  %646 = vmatpush3.bf16.msra.mxu0 %v789_v7 }
  0x7c   : > { %677 = vmatprep.subr.bf16.mxu1 %v790_v8  ;;  %647 = vmatprep.subr.bf16.mxu0 %v790_v8 }
  0x7f   : > { %685 = vmatpush3.bf16.msra.mxu1 %v791_v9  ;;  %648 = vmatpush3.bf16.msra.mxu0 %v791_v9 }
  0x80   : > { %678 = vmatprep.subr.bf16.mxu1 %v792_v10  ;;  %649 = vmatprep.subr.bf16.mxu0 %v792_v10 }
  0x83   : > { %686 = vmatpush3.bf16.msra.mxu1 %v793_v13  ;;  %650 = vmatpush3.bf16.msra.mxu0 %v793_v13 }
  0x84   : > { %679 = vmatprep.subr.bf16.mxu1 %v794_v14  ;;  %651 = vmatprep.subr.bf16.mxu0 %v794_v14 }
  0x87   : > { %687 = vmatpush3.bf16.msra.mxu1 %v795_v15  ;;  %652 = vmatpush3.bf16.msra.mxu0 %v795_v15 }
  0x88   : > { %680 = vmatprep.subr.bf16.mxu1 %v796_v16  ;;  %653 = vmatprep.subr.bf16.mxu0 %v796_v16 }
  0x8b   : > { %688 = vmatpush3.bf16.msra.mxu1 %v797_v17  ;;  %654 = vmatpush3.bf16.msra.mxu0 %v797_v17 }
  0x8e   : > { %450 = vmatmul.mubr.bf16.vlgmr.msra.gmra.mrb[0].mxu1 %v798_v19  ;;  %442 = vmatmul.mubr.bf16.vlgmr.msra.gmra.mrb[0].mxu0 %v801_v20 }
  0x8f   : > { %457 = vmatprep.mubr.bf16.mxu1 %v619_v21 }
  0x96   : > { %458 = vmatmul.mubr.bf16.gmra.mrb[4].mxu1 %v618_v22 }
 0x161   : > { %v661_v23 = vpop.f32.mrb[0].mxu1  ;;  %v655_v24 = vpop.f32.mrb[0].mxu0 }
 0x162   : > { %v662_v25 = vpop.f32.mrb[1].mxu1  ;;  %v656_v27 = vpop.f32.mrb[1].mxu0 }
 0x163   : > { %v663_v29 = vadd.f32 %v662_v25, %v661_v23  ;;  %v664_v30 = vpop.f32.mrb[2].mxu1  ;;  %v657_v31 = vadd.f32 %v656_v27, %v655_v24  ;;  %v658_v32 = vpop.f32.mrb[2].mxu0 }
 0x164   : > { %v665_v33 = vpop.f32.mrb[3].mxu1  ;;  %v659_v35 = vpop.f32.mrb[3].mxu0 }
 0x165   : > { %v472_v37 = vadd.f32 %v663_v29, %v467_v26  ;;  %v666_v38 = vadd.f32 %v665_v33, %v664_v30  ;;  %v470_v39 = vadd.f32 %v657_v31, %v465_v28  ;;  %v660_v40 = vadd.f32 %v659_v35, %v658_v32 }
 0x167   : > { %477 = vst [vmem:[%s244_s20 + $0x10] sm:$0xff] %v472_v37  ;;  %v473_v41 = vadd.f32 %v666_v38, %v468_v34  ;;  %475 = vst [vmem:[%s244_s20] sm:$0xff] %v470_v39  ;;  %v471_v42 = vadd.f32 %v660_v40, %v466_v36 }
 0x169   : > { %478 = vst [vmem:[%s244_s20 + $0x18] sm:$0xff] %v473_v41  ;;  %476 = vst [vmem:[%s244_s20 + $0x8] sm:$0xff] %v471_v42  ;;  %v667_v43 = vpop.f32.mrb[4].mxu1 }
 0x16a   : > { %v668_v44 = vpop.f32.mrb[5].mxu1 }
 0x16b   : > { %v669_v46 = vadd.f32 %v668_v44, %v667_v43  ;;  %v670_v47 = vpop.f32.mrb[6].mxu1 }
 0x16c   : > { %v671_v48 = vpop.f32.mrb[7].mxu1 }
 0x16d   : > { %v474_v49 = vadd.f32 %v669_v46, %v469_v45 }
 0x16f   : > { %479 = vst [vmem:[%s244_s20 + $0x20] sm:$0xff] %v474_v49 }
 0x170   : > { %905 = shalt.err (!%p902_p2)
}
 0x171   : > { %s906_s26 = scalar_lea.hbm %s1231_s8, 640  ;;  %s910_s6 = scalar_lea.hbm %s1283_s3, 1280 }
 0x172   : > { %p907_p0 = scmp.ne.s32.totalorder %s1231_s8, %s906_s26  ;;  %p911_p6 = scmp.lt.u32.totalorder %s1231_s8, %s1283_s3 }
 0x173   : > { %p912_p7 = scmp.lt.u32.totalorder %s910_s6, %s906_s26  ;;  %p914_p8 = scmp.lt.u32.totalorder %s906_s26, %s1231_s8 }
 0x174   : > { %p908_p4 = pnand %p907_p0, %p1298_p12 }
 0x175   : > { %p913_p11 = por %p912_p7, %p911_p6 }
 0x176   : > { %p909_p13 = pneg %p908_p4 }
 0x177   : > { %p915_p1 = por %p914_p8, %p913_p11 }
 0x179   : > { %p916_p10 = pnand %p915_p1, %p909_p13 }
 0x17b   : > { %919 = shalt.err (!%p916_p10)
}
 0x17c   : > { %s988_s20 = smov 128   ;;  %s989_s24 = smov 8  }
 0x17d   : > { %703 = dma.vmem_to_hbm [thread:$0]  (%p1298_p12), %s1226_s22, 640, %s1231_s8, %s481_s15, %s988_s20, %s988_s20, %s989_s24  }
 0x17e PF: > { %s511_s9 = sand.u32 1, %s958_s12   ;;  %p1299_p3 = scmp.ne.s32.totalorder %s1291_s23, 0 }
 0x17f   : > { %p1300_p5 = scmp.ge.s32.totalorder %s978_s17, 2  ;;  %s512_s10 = scalar_lea.sflag [#allocation4], %s511_s9 }
 0x181   : > { %p717_p9 = pnand %p1300_p5, %p1299_p3 }
 0x183   : > { %953 = dma.done.wait (!%p717_p9), %s512_s10, 640  }
 0x184   : > { %955 = vsyncadd (!%p717_p9), %s512_s10, 4294966656  ;;  %s20_s17 = sadd.s32 1, %s978_s17   ;;  %s1301_s12 = smov %s962_s13 }
 0x185   : > { %p17_p2 = scmp.ge.s32.totalorder %s20_s17, 4   ;;  %s1302_s13 = smov %s966_s14 }
 0x186   : > { %s1303_s14 = smov %s1158_s5  ;;  %s1304_s15 = smov %s974_s16 }
 0x187   : > { %s1305_s16 = smov %s1307_s19  ;;  %19 = sbr.rel (!%p17_p2) target bundleno = 7 (0x7), region = 86 }
 0x18e   :  { %517 = vsyncpa [#allocation3], 1 }
 0x18f   :  { %519 = vsyncpa [#allocation3 + $0x1], 1 }
 0x190   :  { %520 = vsyncpa [#allocation6], 1 }
 0x191   :  { %521 = vsyncpa [#allocation4], 1 }
 0x192   :  { %523 = vsyncpa [#allocation4 + $0x1], 1 }

</bundles_post_ra>
